<compile_context>
chip_gen: v6e
topology: v6e:2x2x1
jax: 0.10.0
libtpu: 0.0.40
codegen_flags: <defaults>
</compile_context>

<pallas_src>
import jax
import jax.numpy as jnp
from jax.experimental import pallas as pl
from jax.experimental.pallas import tpu as pltpu


# ---------------------------------------------------------------------------
# Kernel
# ---------------------------------------------------------------------------
def _fused_hetero_gcn_kernel(a_ref, xw_ref, dd_ref, bt_ref, o_ref):
    """Grid point (i = dst tile, r = relation, k = src tile).

    o[i] = sum_r bias_r + sum_r d_dst_r * sum_k A_r[i, k] @ XW_r[k]
    where XW_r = (X_src_r * d_src_r) @ W_r was folded in the wrapper.
    """
    r = pl.program_id(1)
    k = pl.program_id(2)

    # First visit of this resident output tile: seed with the summed bias.
    @pl.when(jnp.logical_and(r == 0, k == 0))
    def _init_out():
        o_ref[...] = jnp.broadcast_to(bt_ref[...], o_ref.shape)

    # bf16 x bf16 MXU matmul with f32 accumulation; the dst-degree norm is a
    # cheap per-step VPU broadcast-mul (it distributes over the k-sum).
    o_ref[...] += dd_ref[...] * jnp.dot(a_ref[...], xw_ref[...],
                                        preferred_element_type=jnp.float32)


# ---------------------------------------------------------------------------
# Wrapper helpers
# ---------------------------------------------------------------------------
def _round_up(x, m):
    return -(-x // m) * m


def _choose_tiles(n_dst, n_src_max):
    """Lane/sublane-aligned tiles, sized for the smallest VMEM budget (v7x),
    padding-aware, and keeping >= 2 dst tiles when the dst axis is big enough
    (v7x shards the 'parallel' dst axis across its two TensorCores)."""
    nd8 = _round_up(n_dst, 8)
    if nd8 <= 256:
        tile_dst, nd_pad = nd8, nd8
    elif nd8 <= 1024:
        tile_dst = _round_up(nd8, 16) // 2          # exactly two dst tiles
        nd_pad = 2 * tile_dst
    else:
        tile_dst = 512
        nd_pad = _round_up(nd8, tile_dst)

    ns128 = _round_up(n_src_max, 128)
    if ns128 <= 512:
        tile_src, ns_pad = ns128, ns128
    else:
        # pick the k-tile that minimises total padding (tie-break: larger tile)
        tile_src, ns_pad = min(
            ((t, _round_up(ns128, t)) for t in (512, 384, 256)),
            key=lambda tp: (tp[1], -tp[0]))
    return tile_dst, nd_pad, tile_src, ns_pad


def _pad2(x, rows, cols):
    return jnp.pad(x, ((0, rows - x.shape[0]), (0, cols - x.shape[1])))


def fused_relations_to_dst(rel_inputs):
    """All relations targeting one dst node type, fused into one pallas_call.

    rel_inputs: list of (A[dst, src] 0/1, X_src[Ns, Fin], W[Fin, Fout], b[Fout])
    Returns Y[n_dst, Fout] = sum_r GraphConv_r(A_r, X_r)   (norm='both', bias).
    """
    n_dst = rel_inputs[0][0].shape[0]
    f_in, f_out = rel_inputs[0][2].shape
    n_src_max = max(a.shape[1] for a, _, _, _ in rel_inputs)

    tile_dst, nd_pad, tile_src, ns_pad = _choose_tiles(n_dst, n_src_max)
    f_out_pad = _round_up(f_out, 128)
    num_rel = len(rel_inputs)

    a_list, xw_list, dd_list = [], [], []
    b_total = jnp.zeros((f_out,), jnp.float32)
    for a, x, w, b in rel_inputs:
        a = a.astype(jnp.float32)
        # degree norms computed once per relation on the unpadded adjacency
        d_src = jnp.maximum(a.sum(axis=0), 1.0) ** -0.5        # (Ns,)
        d_dst = jnp.maximum(a.sum(axis=1), 1.0) ** -0.5        # (Nd,)
        # fold the src norm AND the projection W into X (f_out_pad <= f_in_pad)
        xw = (x.astype(jnp.float32) * d_src[:, None]) @ w.astype(jnp.float32)
        a_list.append(_pad2(a, nd_pad, ns_pad).astype(jnp.bfloat16))   # 0/1 exact
        xw_list.append(_pad2(xw, ns_pad, f_out_pad).astype(jnp.bfloat16))
        dd_list.append(jnp.pad(d_dst, (0, nd_pad - n_dst))[:, None])
        b_total = b_total + b.astype(jnp.float32)

    a_stack = jnp.stack(a_list)                                   # (R, Nd_p, Ns_p)  bf16
    xw_stack = jnp.stack(xw_list)                                 # (R, Ns_p, Fout_p) bf16
    dd_stack = jnp.stack(dd_list)                                 # (R, Nd_p, 1)     f32
    b_total = jnp.pad(b_total, (0, f_out_pad - f_out))[None, :]   # (1, Fout_p)      f32

    grid = (nd_pad // tile_dst, num_rel, ns_pad // tile_src)

    out = pl.pallas_call(
        _fused_hetero_gcn_kernel,
        out_shape=jax.ShapeDtypeStruct((nd_pad, f_out_pad), jnp.float32),
        grid=grid,
        in_specs=[
            pl.BlockSpec((None, tile_dst, tile_src), lambda i, r, k: (r, i, k)),
            pl.BlockSpec((None, tile_src, f_out_pad), lambda i, r, k: (r, k, 0)),
            pl.BlockSpec((None, tile_dst, 1), lambda i, r, k: (r, i, 0)),
            pl.BlockSpec((1, f_out_pad), lambda i, r, k: (0, 0)),
        ],
        out_specs=pl.BlockSpec((tile_dst, f_out_pad), lambda i, r, k: (i, 0)),
        compiler_params=pltpu.CompilerParams(
            dimension_semantics=("parallel", "arbitrary", "arbitrary"),
            vmem_limit_bytes=32 * 1024 * 1024),
    )(a_stack, xw_stack, dd_stack, b_total)

    return out[:n_dst, :f_out]


def multi_relational_conv(graph, h, params):
    """Forward of MultiRelationalConv.

    graph : dict {(src_ntype, rel_name, dst_ntype): dense adjacency A[dst, src]}
    h     : dict {ntype: features [N_ntype, in_feats]}
    params: dict {rel_name: (W [in_feats, out_feats], b [out_feats])}
    """
    # group relations by destination node type (fuses aggregate='sum')
    by_dst = {}
    for (src, rel, dst), a in graph.items():
        if src not in h:          # HeteroGraphConv skips relations w/o src feats
            continue
        w, b = params[rel]
        by_dst.setdefault(dst, []).append((a, h[src], w, b))

    h_new = {dst: fused_relations_to_dst(rel_inputs)
             for dst, rel_inputs in by_dst.items()}

    for ntype in h:               # passthrough for node types with no messages
        if ntype not in h_new:
            h_new[ntype] = h[ntype]
    return h_new


# ---------------------------------------------------------------------------
# Pure-JAX references
# ---------------------------------------------------------------------------
def _ref_rel_graphconv(a, x, w, b):
    """DGL GraphConv, norm='both', bias=True, dense adjacency, full f32."""
    d_src = jnp.maximum(a.sum(axis=0), 1.0) ** -0.5
    d_dst = jnp.maximum(a.sum(axis=1), 1.0) ** -0.5
    return (d_dst[:, None] * (a @ (x * d_src[:, None]))) @ w + b


def _ref_rel_graphconv_bf16(a, x, w, b):
    """Same math but with the kernel's data path: XW rounded to bf16 before the
    (exact, 0/1) adjacency matmul with f32 accumulation."""
    d_src = jnp.maximum(a.sum(axis=0), 1.0) ** -0.5
    d_dst = jnp.maximum(a.sum(axis=1), 1.0) ** -0.5
    xw = ((x * d_src[:, None]) @ w).astype(jnp.bfloat16).astype(jnp.float32)
    return d_dst[:, None] * (a @ xw) + b


if __name__ == "__main__":
    key = jax.random.PRNGKey(0)
    in_feats, out_feats = 16, 32
    n_user, n_item, n_tag = 16, 16, 8

    # deterministic synthetic heterograph (dense adjacencies, A[dst, src])
    k = iter(jax.random.split(key, 16))
    graph = {
        ("user", "follows", "user"):
            jax.random.bernoulli(next(k), 0.3, (n_user, n_user)).astype(jnp.float32),
        ("user", "buys", "item"):
            jax.random.bernoulli(next(k), 0.3, (n_item, n_user)).astype(jnp.float32),
        ("item", "boughtby", "user"):
            jax.random.bernoulli(next(k), 0.3, (n_user, n_item)).astype(jnp.float32),
    }

    # node features; 'tag' has no relation -> exercises the passthrough branch
    h = {
        "user": jax.random.normal(next(k), (n_user, in_feats), jnp.float32),
        "item": jax.random.normal(next(k), (n_item, in_feats), jnp.float32),
        "tag":  jax.random.normal(next(k), (n_tag, in_feats), jnp.float32),
    }

    # deterministic per-relation GraphConv parameters (W: [in, out], b: [out])
    params = {
        rel: (0.1 * jax.random.normal(next(k), (in_feats, out_feats), jnp.float32),
              0.01 * jax.random.normal(next(k), (out_feats,), jnp.float32))
        for rel in ("follows", "buys", "boughtby")
    }

    out = multi_relational_conv(graph, h, params)
    out = jax.tree_util.tree_map(jax.block_until_ready, out)

    # build both references, summed per dst node type + passthrough
    ref_f32, ref_bf16 = {}, {}
    for (src, rel, dst), a in graph.items():
        w, b = params[rel]
        y32 = _ref_rel_graphconv(a, h[src], w, b)
        y16 = _ref_rel_graphconv_bf16(a, h[src], w, b)
        ref_f32[dst] = y32 if dst not in ref_f32 else ref_f32[dst] + y32
        ref_bf16[dst] = y16 if dst not in ref_bf16 else ref_bf16[dst] + y16
    for ntype in h:
        if ntype not in ref_f32:
            ref_f32[ntype] = h[ntype]
            ref_bf16[ntype] = h[ntype]

    for ntype in ref_f32:
        assert out[ntype].shape == ref_f32[ntype].shape, ntype
        # tight check against the bf16-consistent data path (structure exact)
        assert jnp.allclose(out[ntype], ref_bf16[ntype], atol=1e-4, rtol=1e-4), ntype
        # loose check against the full-f32 module semantics (bf16 XW rounding)
        assert jnp.allclose(out[ntype], ref_f32[ntype], atol=2e-2, rtol=2e-2), ntype

    print("KERNEL_OK")
</pallas_src>

<mosaic_0001>
module attributes {stable_mosaic.version = 11 : i64} {
  func.func @_fused_hetero_gcn_kernel(%arg0: i32, %arg1: i32, %arg2: i32, %arg3: memref<1x16x128xbf16, #tpu.memory_space<vmem>>, %arg4: memref<1x128x128xbf16, #tpu.memory_space<vmem>>, %arg5: memref<1x16x1xf32, #tpu.memory_space<vmem>>, %arg6: memref<1x128xf32, #tpu.memory_space<vmem>>, %arg7: memref<16x128xf32, #tpu.memory_space<vmem>>) attributes {dimension_semantics = [#tpu.dimension_semantics<parallel>, #tpu.dimension_semantics<arbitrary>, #tpu.dimension_semantics<arbitrary>], iteration_bounds = array<i64: 1, 2, 1>, scalar_prefetch = 0 : i64, scratch_operands = 0 : i64, tpu.core_type = #tpu.core_type<tc>, window_params = [{transform_indices = @transform_0, window_bounds = array<i64: 1, 16, 128>}, {transform_indices = @transform_1, window_bounds = array<i64: 1, 128, 128>}, {transform_indices = @transform_2, window_bounds = array<i64: 1, 16, 1>}, {pipeline_mode = #tpu.pipeline_mode<synchronous>, transform_indices = @transform_3, window_bounds = array<i64: 1, 128>}, {transform_indices = @transform_4, window_bounds = array<i64: 16, 128>}]} {
    %c0_i32 = arith.constant 0 : i32
    %0 = arith.cmpi eq, %arg1, %c0_i32 : i32
    %c0_i32_0 = arith.constant 0 : i32
    %1 = arith.cmpi eq, %arg2, %c0_i32_0 : i32
    %2 = arith.andi %0, %1 : i1
    %3 = arith.extui %2 : i1 to i32
    %c0_i32_1 = arith.constant 0 : i32
    %4 = arith.cmpi ne, %3, %c0_i32_1 : i32
    scf.if %4 {
      %c0_14 = arith.constant 0 : index
      %c0_15 = arith.constant 0 : index
      %17 = vector.load %arg6[%c0_14, %c0_15] : memref<1x128xf32, #tpu.memory_space<vmem>>, vector<1x128xf32>
      %18 = vector.shape_cast %17 : vector<1x128xf32> to vector<1x128xf32>
      %19 = vector.broadcast %18 : vector<1x128xf32> to vector<16x128xf32>
      %c0_16 = arith.constant 0 : index
      %c0_17 = arith.constant 0 : index
      %20 = vector.load %arg7[%c0_16, %c0_17] : memref<16x128xf32, #tpu.memory_space<vmem>>, vector<16x128xf32>
      tpu.vector_store %arg7[%c0_16, %c0_17], %19 {strides = array<i32>} : memref<16x128xf32, #tpu.memory_space<vmem>>, vector<16x128xf32>,
    } else {
    }
    %c0 = arith.constant 0 : index
    %c0_2 = arith.constant 0 : index
    %5 = vector.load %arg7[%c0, %c0_2] : memref<16x128xf32, #tpu.memory_space<vmem>>, vector<16x128xf32>
    %c0_3 = arith.constant 0 : index
    %c0_4 = arith.constant 0 : index
    %c0_5 = arith.constant 0 : index
    %6 = vector.load %arg5[%c0_3, %c0_4, %c0_5] : memref<1x16x1xf32, #tpu.memory_space<vmem>>, vector<1x16x1xf32>
    %7 = vector.shape_cast %6 : vector<1x16x1xf32> to vector<16x1xf32>
    %c0_6 = arith.constant 0 : index
    %c0_7 = arith.constant 0 : index
    %c0_8 = arith.constant 0 : index
    %8 = vector.load %arg3[%c0_6, %c0_7, %c0_8] : memref<1x16x128xbf16, #tpu.memory_space<vmem>>, vector<1x16x128xbf16>
    %9 = vector.shape_cast %8 : vector<1x16x128xbf16> to vector<16x128xbf16>
    %c0_9 = arith.constant 0 : index
    %c0_10 = arith.constant 0 : index
    %c0_11 = arith.constant 0 : index
    %10 = vector.load %arg4[%c0_9, %c0_10, %c0_11] : memref<1x128x128xbf16, #tpu.memory_space<vmem>>, vector<1x128x128xbf16>
    %11 = vector.shape_cast %10 : vector<1x128x128xbf16> to vector<128x128xbf16>
    %cst = arith.constant dense<0.000000e+00> : vector<16x128xf32>
    %12 = tpu.matmul %9, %11, %cst {dimension_numbers = #tpu.dot_dimension_numbers<[1], [0], [0], [1], [0, 0, 1, 1], [], []>} : vector<16x128xbf16>, vector<128x128xbf16>, vector<16x128xf32> -> vector<16x128xf32>
    %13 = vector.broadcast %7 : vector<16x1xf32> to vector<16x128xf32>
    %14 = arith.mulf %13, %12 : vector<16x128xf32>
    %15 = arith.addf %5, %14 : vector<16x128xf32>
    %c0_12 = arith.constant 0 : index
    %c0_13 = arith.constant 0 : index
    %16 = vector.load %arg7[%c0_12, %c0_13] : memref<16x128xf32, #tpu.memory_space<vmem>>, vector<16x128xf32>
    tpu.vector_store %arg7[%c0_12, %c0_13], %15 {strides = array<i32>} : memref<16x128xf32, #tpu.memory_space<vmem>>, vector<16x128xf32>,
    return
  }
  func.func @transform_0(%arg0: i32, %arg1: i32, %arg2: i32) -> (i32, i32, i32) {
    %c0_i32 = arith.constant 0 : i32
    return %arg1, %arg0, %arg2 : i32, i32, i32
  }
  func.func @transform_1(%arg0: i32, %arg1: i32, %arg2: i32) -> (i32, i32, i32) {
    %c0_i32 = arith.constant 0 : i32
    %c0_i32_0 = arith.constant 0 : i32
    return %arg1, %arg2, %c0_i32 : i32, i32, i32
  }
  func.func @transform_2(%arg0: i32, %arg1: i32, %arg2: i32) -> (i32, i32, i32) {
    %c0_i32 = arith.constant 0 : i32
    %c0_i32_0 = arith.constant 0 : i32
    return %arg1, %arg0, %c0_i32 : i32, i32, i32
  }
  func.func @transform_3(%arg0: i32, %arg1: i32, %arg2: i32) -> (i32, i32) {
    %c0_i32 = arith.constant 0 : i32
    %c0_i32_0 = arith.constant 0 : i32
    %c0_i32_1 = arith.constant 0 : i32
    return %c0_i32, %c0_i32_0 : i32, i32
  }
  func.func @transform_4(%arg0: i32, %arg1: i32, %arg2: i32) -> (i32, i32) {
    %c0_i32 = arith.constant 0 : i32
    %c0_i32_0 = arith.constant 0 : i32
    return %arg0, %c0_i32 : i32, i32
  }
}

</mosaic_0001>

<bundles_post_ra>
// kernel: tpu_custom_call.1
= control target key start
LH: loop header
LB: loop body
LE: loop exit
PB: predicated region body
PF: predicated region fallthrough
CT: control target
= control target key end

     0   :  { %9 = vsyncpa [#allocation3], 0  ;;  %s1000_s0 = inlined_call_operand.vmem [shape: bf16[2,16,128], index: 0, kind: input, shape index: {}]   ;;  %s1001_s1 = inlined_call_operand.hbm [shape: bf16[2,128,128], index: 1, kind: input, shape index: {}]   ;;  %s1002_s2 = inlined_call_operand.vmem [shape: f32[2,16,1], index: 2, kind: input, shape index: {}]   ;;  %s1003_s3 = inlined_call_operand.vmem [shape: f32[1,128], index: 3, kind: input, shape index: {}]   ;;  %s1004_s4 = inlined_call_operand.hbm [shape: f32[16,128], index: 4, kind: output, shape index: {}]  }
   0x1   :  { %11 = vsyncpa [#allocation3 + $0x1], 0 }
   0x2   :  { %12 = vsyncpa [#allocation4], 0  ;;  %s865_s15 = smov 0   ;;  %s867_s16 = smov 0  }
   0x3   :  { %s869_s17 = smov 0   ;;  %s871_s18 = smov 0  }
   0x4   :  { %s873_s19 = smov 0   ;;  %s875_s20 = smov 0  }
   0x5 LB: > { %s584_s21 = sadd.s32 4294967295, %s829_s20   ;;  %s33_s22 = sadd.s32 1, %s825_s19  ;;  %s829_s20 = sphi %s875_s20, %s18_s20   ;;  %s825_s19 = sphi %s873_s19, %s1013_s19   ;;  %s821_s18 = sphi %s871_s18, %s1012_s18   ;;  %s817_s17 = sphi %s869_s17, %s1011_s17   ;;  %s813_s16 = sphi %s867_s16, %s1010_s16   ;;  %s809_s15 = sphi %s865_s15, %s1009_s15  }
   0x6   : > { %p35_p0 = scmp.ge.s32.totalorder %s33_s22, 2  ;;  %s76_s23 = sadd.s32 1, %s817_s17 }
   0x7   : > { %p83_p1 = scmp.ne.s32.totalorder %s817_s17, %s813_s16  ;;  %p84_p2 = scmp.eq.s32.totalorder %s829_s20, 0 }
   0x8   : > { %s1015_s22 = smov (%p35_p0, %s33_s22), 0  ;;  %p89_p4 = scmp.ne.s32.totalorder %s813_s16, %s809_s15 }
   0x9   : > { %p901_p3 = por %p84_p2, %p83_p1  ;;  %s71_s25 = ssub.s32 %s825_s19, %s1015_s22 }
   0xa   : > { %p90_p5 = scmp.eq.s32.totalorder %s584_s21, 0  ;;  %p74_p6 = scmp.eq.s32.totalorder %s71_s25, 0 }
   0xb   : > { %p654_p8 = scmp.lt.s32.totalorder %s829_s20, 2  ;;  %s207_s28 = sand.u32 1, %s817_s17  }
   0xc   : > { %p910_p7 = por %p90_p5, %p89_p4  ;;  %s611_s29 = sshll.u32 %s825_s19, 10 }
   0xd   : > { %s916_s27 = scalar_select %p74_p6, %s817_s17, %s76_s23  }
   0xe   : > { %s587_s30 = sshll.u32 %s207_s28, 6  ;;  %s219_s7 = scalar_lea.hbm %s1001_s1, %s611_s29 }
   0xf   : > { %s211_s8 = scalar_lea.vmem [#allocation2], %s587_s30  ;;  %p925_p9 = pnand %p654_p8, %p901_p3 }
  0x10   : > { %s220_s9 = sshll.u32 %s211_s8, 4  ;;  %s208_s11 = scalar_lea.sflag [#allocation3], %s207_s28  ;;  %s221_s9 = int_to_ptr.vmem [resolvable:$true] %s220_s9 }
  0x11   : > { %p725_p10 = pneg %p925_p9  ;;  %s736_s12 = scalar_lea.vmem %s221_s9, 1024 }
  0x12   : > { %p737_p11 = scmp.ne.s32.totalorder %s221_s9, %s736_s12  ;;  %s831_s13 = smov [#allocation2]  }
  0x13   : > { %s741_s14 = sshll.u32 %s831_s13, 4  ;;  %s742_s14 = int_to_ptr.vmem [resolvable:$false] %s741_s14 }
  0x14   : > { %p739_p12 = pnand %p737_p11, %p725_p10  ;;  %s743_s15 = scalar_lea.vmem %s742_s14, 2048 }
  0x15   : > { %p744_p0 = scmp.lt.s32.totalorder %s221_s9, %s742_s14  ;;  %p745_p1 = scmp.lt.s32.totalorder %s743_s15, %s736_s12 }
  0x16   : > { %p740_p13 = pneg %p739_p12 }
  0x17   : > { %p746_p2 = por %p745_p1, %p744_p0 }
  0x19   : > { %p747_p3 = pnand %p746_p2, %p740_p13 }
  0x1b   : > { %750 = shalt.err (!%p747_p3)
}
  0x1c   : > { %s832_s23 = smov 64   ;;  %s833_s24 = smov 4  }
  0x1d   : > { %653 = dma.hbm_to_vmem [thread:$0]  (!%p925_p9), %s219_s7, 1024, %s221_s9, %s208_s11, %s832_s23, %s832_s23, %s833_s24  }
  0x1e   : > { %p590_p4 = scmp.ge.s32.totalorder %s829_s20, 1  ;;  %p241_p5 = scmp.lt.s32.totalorder %s829_s20, 3 }
  0x20   : > { %p242_p6 = pnand %p590_p4, %p241_p5 }
  0x21   : > { %s247_s25 = sand.u32 (!%p242_p6), 1, %s813_s16  }
  0x22   : > { %245 = sbr.rel (%p242_p6) target bundleno = 287 (0x11f), region = 36  ;;  %s591_s28 = sshll.u32 (!%p242_p6), %s247_s25, 6 }
  0x23   : > { %s248_s29 = scalar_lea.sflag (!%p242_p6), [#allocation3], %s247_s25  ;;  %s936_s30 = scalar_lea.vmem (!%p242_p6), [#allocation2], %s591_s28 }
  0x27   : > { %800 = dma.done.wait (%p910_p7), %s248_s29, 1024  }
  0x28   : > { %802 = vsyncadd (%p910_p7), %s248_s29, 4294966272  ;;  %p293_p8 = scmp.lt.s32.totalorder %s821_s18, 1  ;;  %p318_p9 = scmp.eq.s32.totalorder %s821_s18, 0 }
  0x29   : > { %v597_v0 = vld [vmem:[%s1003_s3] ss:$0 sm:$0xff] (%p318_p9) }
  0x2a   : > { %s1017_s18 = smov (!%p293_p8, %s821_s18), 1  ;;  %323 = sbr.rel (!%p318_p9) target bundleno = 47 (0x2f), region = 44  ;;  %331 = vst [vmem:[#allocation5] sm:$0xff] (%p318_p9), %v597_v0  ;;  %332 = vst [vmem:[#allocation5 + $0x8] sm:$0xff] (%p318_p9), %v597_v0 }
  0x2b   : > { %s612_s5 = sshll.u32 %s1017_s18, 3  ;;  %s613_s6 = sshll.u32 %s1017_s18, 4 }
  0x2c   : > { %s948_s9 = scalar_lea.vmem %s1000_s0, %s612_s5  ;;  %s314_s12 = scalar_lea.vmem %s1002_s2, %s613_s6 }
  0x2f PF: > { %v714_v1 = vld [vmem:[%s936_s30 + $0x38] sm:$0xff]   ;;  %v834_v2 = vmov 0.0   ;;  %v715_v3 = vld [vmem:[%s936_s30 + $0x30] sm:$0xff]   ;;  %vm835_vm0 = vmmov 0   ;;  %v836_v4 = vmov 0   ;;  %v716_v5 = vld [vmem:[%s936_s30 + $0x28] sm:$0xff]  }
  0x30   : > { %624 = vmatprep.subr.bf16.mxu0 %v834_v2  ;;  %640 = vmatprep.mubr.msk.bf16.mxu0 %vm835_vm0, %v834_v2  ;;  %v335_v6 = vld [vmem:[%s314_s12] sm:$0xff]  ;;  %v336_v8 = vld [vmem:[%s314_s12 + $0x8] sm:$0xff]  ;;  %v718_v9 = vld [vmem:[%s936_s30 + $0x18] sm:$0xff]   ;;  %s837_s18 = smov [#allocation5]   ;;  %p967_p7 = scmp.eq.s32.totalorder %s584_s21, 1 }
  0x31   : > { %625 = vmatpush3.bf16.msra.mxu0 %v714_v1  ;;  %713 = vset.pattern.permute.xlu0 %v836_v4  ;;  %v717_v7 = vld [vmem:[%s936_s30 + $0x20] sm:$0xff]   ;;  %v719_v10 = vld [vmem:[%s936_s30 + $0x10] sm:$0xff]   ;;  %v720_v11 = vld [vmem:[%s936_s30 + $0x8] sm:$0xff]   ;;  %s475_s14 = sshll.u32 %s837_s18, 4  ;;  %s476_s14 = int_to_ptr.vmem [resolvable:$true] %s475_s14 }
  0x32   : > { %626 = vmatprep.subr.bf16.mxu0 %v834_v2  ;;  %452 = vperm.xlu0 %713, %v335_v6   ;;  %v721_v12 = vld [vmem:[%s936_s30] sm:$0xff]   ;;  %v334_v21 = vld [vmem:[#allocation5 + $0x8] sm:$0xff]  ;;  %s751_s23 = scalar_lea.vmem %s476_s14, 256  ;;  %p758_p13 = scmp.lt.s32.totalorder %s476_s14, %s476_s14 }
  0x33   : > { %v722_v13 = vld [vmem:[%s948_s9] sm:$0xff]   ;;  %p752_p10 = scmp.ne.s32.totalorder %s476_s14, %s751_s23  ;;  %p759_p0 = scmp.lt.s32.totalorder %s751_s23, %s751_s23 }
  0x34   : > { %v333_v15 = vld [vmem:[#allocation5] sm:$0xff] }
  0x35   : > { %627 = vmatpush3.bf16.msra.mxu0 %v715_v3  ;;  %p753_p11 = pnand %p752_p10, %p967_p7  ;;  %p760_p1 = por %p759_p0, %p758_p13 }
  0x36   : > { %628 = vmatprep.subr.bf16.mxu0 %v834_v2  ;;  %457 = vperm.xlu0 %713, %v336_v8  }
  0x37   : > { %p754_p12 = pneg %p753_p11 }
  0x39   : > { %629 = vmatpush3.bf16.msra.mxu0 %v716_v5  ;;  %p761_p2 = pnand %p760_p1, %p754_p12 }
  0x3a   : > { %630 = vmatprep.subr.bf16.mxu0 %v834_v2 }
  0x3d   : > { %631 = vmatpush3.bf16.msra.mxu0 %v717_v7 }
  0x3e   : > { %632 = vmatprep.subr.bf16.mxu0 %v834_v2 }
  0x41   : > { %633 = vmatpush3.bf16.msra.mxu0 %v718_v9 }
  0x42   : > { %634 = vmatprep.subr.bf16.mxu0 %v834_v2 }
  0x45   : > { %635 = vmatpush3.bf16.msra.mxu0 %v719_v10 }
  0x46   : > { %636 = vmatprep.subr.bf16.mxu0 %v834_v2 }
  0x49   : > { %637 = vmatpush3.bf16.msra.mxu0 %v720_v11 }
  0x4a   : > { %638 = vmatprep.subr.bf16.mxu0 %v834_v2 }
  0x4d   : > { %639 = vmatpush3.bf16.msra.mxu0 %v721_v12 }
  0x50   : > { %641 = vmatmul.mubr.bf16.vlgmr.msra.gmra.mxu0 %v722_v13 }
  0xad   : > { %v453_v14 = vpop.permute.xlu0 %452 }
  0xb1   : > { %v458_v20 = vpop.permute.xlu0 %457 }
 0x110   : > { %v443_v16 = vpop.f32.mrf.mxu0 }
 0x111   : > { %v460_v17 = vmul.f32 %v453_v14, %v443_v16 }
 0x112   : > { %v642_v18 = vpop.f32.mrf.mxu0 }
 0x113   : > { %v462_v19 = vadd.f32 %v460_v17, %v333_v15 }
 0x114   : > { %v446_v22 = vpop.f32.mrf.mxu0 }
 0x115   : > { %464 = vst [vmem:[#allocation5] sm:$0xff] %v462_v19  ;;  %v461_v23 = vmul.f32 %v458_v20, %v446_v22 }
 0x116   : > { %v643_v24 = vpop.f32.mrf.mxu0 }
 0x117   : > { %v463_v25 = vadd.f32 %v461_v23, %v334_v21 }
 0x119   : > { %465 = vst [vmem:[#allocation5 + $0x8] sm:$0xff] %v463_v25 }
 0x11a   : > { %764 = shalt.err (!%p761_p2)
}
 0x11b   : > { %s838_s24 = smov 128   ;;  %s839_s21 = smov 8  }
 0x11c   : > { %647 = dma.vmem_to_hbm [thread:$0]  (%p967_p7), %s476_s14, 256, %s1004_s4, [#allocation4], %s838_s24, %s838_s24, %s839_s21  }
 0x11d   : > { %804 = dma.done.wait (%p967_p7), [#allocation4], 256  }
 0x11e   : > { %806 = vsyncadd (%p967_p7), [#allocation4], 4294967040 }
 0x11f PF: > { %s18_s20 = sadd.s32 1, %s829_s20   ;;  %s1009_s15 = smov %s813_s16 }
 0x120   : > { %p15_p3 = scmp.ge.s32.totalorder %s18_s20, 4   ;;  %s1010_s16 = smov %s817_s17 }
 0x121   : > { %s1011_s17 = smov %s916_s27  ;;  %s1012_s18 = smov %s825_s19 }
 0x122   : > { %s1013_s19 = smov %s1015_s22  ;;  %17 = sbr.rel (!%p15_p3) target bundleno = 5 (0x5), region = 84 }
 0x127   :  { %491 = vsyncpa [#allocation3], 1 }
 0x128   :  { %493 = vsyncpa [#allocation3 + $0x1], 1 }
 0x129   :  { %494 = vsyncpa [#allocation4], 1 }
 0x12a   :  { %496 = vsyncpa [#allocation4 + $0x1], 1 }

</bundles_post_ra>
